<compile_context>
chip_gen: v5e
topology: v5e:2x2
jax: 0.10.0
libtpu: 0.0.40
codegen_flags: <defaults>
</compile_context>

<pallas_src>
import functools

import numpy as np
import jax
import jax.numpy as jnp
from jax import lax
from jax.experimental import pallas as pl
from jax.experimental.pallas import tpu as pltpu


_TAPS = tuple((dy, dx) for dy in (-1, 0, 1) for dx in (-1, 0, 1))


def _tap_masks(H, W):
    """(9, H*W) float32 {0,1}: mask[t, y*W + x] == 1 iff (y+dy, x+dx) is inside the image."""
    row = np.arange(H * W, dtype=np.int64) // W
    col = np.arange(H * W, dtype=np.int64) % W
    masks = np.zeros((9, H * W), np.float32)
    for t, (dy, dx) in enumerate(_TAPS):
        ok = (row + dy >= 0) & (row + dy < H) & (col + dx >= 0) & (col + dx < W)
        masks[t] = ok.astype(np.float32)
    return jnp.asarray(masks)


def _choose_channel_block(C, HW, itemsize, budget_bytes=24 << 20):
    """Largest channel block whose double-buffered input tile fits the VMEM budget."""
    if 2 * C * HW * itemsize <= budget_bytes:
        return C                                    # whole channel dim in one grid step
    cap = max(8, int(budget_bytes // (2 * HW * itemsize)) // 8 * 8)
    for cb in range(cap, 7, -8):
        if C % cb == 0:
            return cb                               # multiple of 8 -> legal (8,128) block
    # TODO(synk): zero-pad C to a multiple of 8 for channel counts with no usable divisor.
    return C


def spatial_gate_kernel(w_ref, b_ref, m_ref, x_ref, o_ref, acc_ref, *, H, W):
    # w_ref : VMEM (CB, 9)      flipped 3x3 weights for this channel block
    # b_ref : SMEM (1,)         bias
    # m_ref : VMEM (9, H*W)     {0,1} border masks, one row per tap
    # x_ref : VMEM (1, CB, H*W) input tile (one batch element, channel block, flat spatial)
    # o_ref : VMEM (1, 1, H*W)  output tile (written on the last channel step)
    # acc_ref: VMEM (9, H*W) f32 per-tap accumulator, persistent across the channel axis
    HW = H * W
    c_blk = pl.program_id(1)

    # Cast the tile in VMEM (no-op for f32 input, keeps bf16 in HBM) and contract the
    # channel dim on the MXU: (CB,9)^T @ (CB,HW) -> (9,HW) per-tap channel-weighted slabs.
    xb = x_ref[0].astype(jnp.float32)
    taps = lax.dot_general(
        w_ref[...], xb,
        dimension_numbers=(((0,), (0,)), ((), ())),
        preferred_element_type=jnp.float32)

    @pl.when(c_blk == 0)
    def _():
        acc_ref[...] = taps

    @pl.when(c_blk != 0)
    def _():
        acc_ref[...] = acc_ref[...] + taps

    # Finalize once per output tile: shift each tap slab into place (XLU roll), zero the
    # wrapped / out-of-image positions, sum the 9 taps, add bias, sigmoid.
    @pl.when(c_blk == pl.num_programs(1) - 1)
    def _():
        acc = acc_ref[...]
        total = None
        for t, (dy, dx) in enumerate(_TAPS):
            part = acc[t:t + 1, :]                      # (1, HW)
            shift = dy * W + dx
            if shift != 0:
                # out[p] picks up contribution from flat position p + shift; the roll
                # commutes with the channel contraction, and the mask kills wraparound.
                part = pltpu.roll(part, (-shift) % HW, 1)
                part = part * m_ref[t:t + 1, :]
            total = part if total is None else total + part
        o_ref[0] = jax.nn.sigmoid(total + b_ref[0]).astype(o_ref.dtype)


def spatial_gate(x, weight, bias):
    """x: (N, C, H, W); weight: (C, 1, 3, 3) ConvTranspose2d weight; bias: (1,)."""
    x = jnp.asarray(x)
    if x.dtype not in (jnp.float32, jnp.bfloat16):
        x = x.astype(jnp.float32)
    N, C, H, W = x.shape
    HW = H * W

    # ConvTranspose2d(stride=1, pad=1, k=3) == correlation with the spatially flipped kernel.
    # Layout (C, 9): column t = (dy+1)*3 + (dx+1) holds W[c, 0, 1-dy, 1-dx].
    w_flip = jnp.asarray(weight, jnp.float32)[:, 0, ::-1, ::-1].reshape(C, 9)
    b = jnp.asarray(bias, jnp.float32).reshape(1)
    masks = _tap_masks(H, W)
    # Contiguous (N, C, H, W) -> (N, C, H*W) is a metadata-only reshape: no extra HBM pass,
    # and no dtype upcast here (native dtype flows into the kernel).
    x2 = x.reshape(N, C, HW)

    CB = _choose_channel_block(C, HW, x.dtype.itemsize)
    n_cblk = C // CB if C % CB == 0 else 1
    if n_cblk == 1:
        CB = C

    # Explicit VMEM sizing (v5e default scoped 16 MiB, v7x physical 64 MiB).
    vmem_bytes = (2 * CB * HW * x.dtype.itemsize      # double-buffered input tile
                  + 2 * CB * 9 * 4                    # double-buffered weight tile
                  + 2 * 9 * HW * 4                    # border masks
                  + 16 * HW * 4                       # acc scratch (9 -> 16 sublane pad)
                  + 2 * HW * 4)                       # double-buffered output tile
    vmem_limit = int(min(64 << 20, max(8 << 20, 3 * vmem_bytes)))

    kernel = functools.partial(spatial_gate_kernel, H=H, W=W)
    out = pl.pallas_call(
        kernel,
        out_shape=jax.ShapeDtypeStruct((N, 1, HW), x.dtype),
        grid=(N, n_cblk),
        in_specs=[
            pl.BlockSpec((CB, 9), lambda n, c: (c, 0)),            # flipped weights
            pl.BlockSpec(memory_space=pltpu.MemorySpace.SMEM),     # bias
            pl.BlockSpec((9, HW), lambda n, c: (0, 0)),            # tap border masks
            pl.BlockSpec((1, CB, HW), lambda n, c: (n, c, 0)),     # input tile
        ],
        out_specs=pl.BlockSpec((1, 1, HW), lambda n, c: (n, 0, 0)),
        scratch_shapes=[pltpu.VMEM((9, HW), jnp.float32)],
        compiler_params=pltpu.CompilerParams(
            dimension_semantics=("parallel", "arbitrary"),
            vmem_limit_bytes=vmem_limit),
    )(w_flip, b, masks, x2)
    return out.reshape(N, 1, H, W)


def spatial_gate_ref(x, weight, bias):
    """Pure-JAX reference of the exact PyTorch ConvTranspose2d(3x3, s=1, p=1) formula."""
    N, C, H, W = x.shape
    xp = jnp.pad(x.astype(jnp.float32), ((0, 0), (0, 0), (1, 1), (1, 1)))
    out = jnp.zeros((N, 1, H, W), jnp.float32)
    for i in range(3):
        for j in range(3):
            # out[y, x] += x[y+1-i, x+1-j] * W[c, 0, i, j]   (zero padded outside)
            patch = xp[:, :, 2 - i:2 - i + H, 2 - j:2 - j + W]  # (N, C, H, W)
            out = out + jnp.einsum("nchw,c->nhw", patch, weight[:, 0, i, j])[:, None]
    return jax.nn.sigmoid(out + bias[0])


if __name__ == "__main__":
    N, C, H, W = 2, 4, 16, 16
    key = jax.random.PRNGKey(0)
    kx, kw, kb = jax.random.split(key, 3)

    x = jax.random.normal(kx, (N, C, H, W), jnp.float32)
    # Deterministic synthetic parameters (ConvTranspose2d(C, 1, 3) shapes).
    weight = 0.1 * jax.random.normal(kw, (C, 1, 3, 3), jnp.float32)
    bias = 0.05 * jax.random.normal(kb, (1,), jnp.float32)

    out = spatial_gate(x, weight, bias)
    out = jax.block_until_ready(out)

    ref = spatial_gate_ref(x, weight, bias)
    assert out.shape == (N, 1, H, W)
    assert jnp.allclose(out, ref, atol=1e-5, rtol=1e-5), "mismatch vs reference"

    print("KERNEL_OK")
</pallas_src>

<mosaic_0001>
module attributes {stable_mosaic.version = 11 : i64} {
  func.func @spatial_gate_kernel(%arg0: i32, %arg1: i32, %arg2: memref<4x9xf32, #tpu.memory_space<vmem>>, %arg3: memref<1xf32, #tpu.memory_space<smem>>, %arg4: memref<9x256xf32, #tpu.memory_space<vmem>>, %arg5: memref<1x4x256xf32, #tpu.memory_space<vmem>>, %arg6: memref<1x1x256xf32, #tpu.memory_space<vmem>>, %arg7: memref<9x256xf32, #tpu.memory_space<vmem>>) attributes {dimension_semantics = [#tpu.dimension_semantics<parallel>, #tpu.dimension_semantics<arbitrary>], iteration_bounds = array<i64: 2, 1>, scalar_prefetch = 0 : i64, scratch_operands = 1 : i64, tpu.core_type = #tpu.core_type<tc>, window_params = [{transform_indices = @transform_0, window_bounds = array<i64: 4, 9>}, {transform_indices = @transform_1, window_bounds = array<i64: 1>}, {pipeline_mode = #tpu.pipeline_mode<synchronous>, transform_indices = @transform_2, window_bounds = array<i64: 9, 256>}, {transform_indices = @transform_3, window_bounds = array<i64: 1, 4, 256>}, {transform_indices = @transform_4, window_bounds = array<i64: 1, 1, 256>}]} {
    %c0 = arith.constant 0 : index
    %c0_0 = arith.constant 0 : index
    %c0_1 = arith.constant 0 : index
    %0 = vector.load %arg5[%c0, %c0_0, %c0_1] : memref<1x4x256xf32, #tpu.memory_space<vmem>>, vector<1x4x256xf32>
    %1 = vector.shape_cast %0 : vector<1x4x256xf32> to vector<4x256xf32>
    %c0_2 = arith.constant 0 : index
    %c0_3 = arith.constant 0 : index
    %2 = vector.load %arg2[%c0_2, %c0_3] : memref<4x9xf32, #tpu.memory_space<vmem>>, vector<4x9xf32>
    %cst = arith.constant dense<0.000000e+00> : vector<9x256xf32>
    %3 = tpu.matmul %2, %1, %cst {dimension_numbers = #tpu.dot_dimension_numbers<[0], [0], [1], [1], [0, 1, 1, 1], [], []>} : vector<4x9xf32>, vector<4x256xf32>, vector<9x256xf32> -> vector<9x256xf32>
    %c0_i32 = arith.constant 0 : i32
    %4 = arith.cmpi eq, %arg1, %c0_i32 : i32
    %5 = arith.extui %4 : i1 to i32
    %c0_i32_4 = arith.constant 0 : i32
    %6 = arith.cmpi ne, %5, %c0_i32_4 : i32
    scf.if %6 {
      %c0_9 = arith.constant 0 : index
      %c0_10 = arith.constant 0 : index
      %13 = vector.load %arg7[%c0_9, %c0_10] : memref<9x256xf32, #tpu.memory_space<vmem>>, vector<9x256xf32>
      tpu.vector_store %arg7[%c0_9, %c0_10], %3 {strides = array<i32>} : memref<9x256xf32, #tpu.memory_space<vmem>>, vector<9x256xf32>,
    } else {
    }
    %c0_i32_5 = arith.constant 0 : i32
    %7 = arith.cmpi ne, %arg1, %c0_i32_5 : i32
    %8 = arith.extui %7 : i1 to i32
    %c0_i32_6 = arith.constant 0 : i32
    %9 = arith.cmpi ne, %8, %c0_i32_6 : i32
    scf.if %9 {
      %c0_9 = arith.constant 0 : index
      %c0_10 = arith.constant 0 : index
      %13 = vector.load %arg7[%c0_9, %c0_10] : memref<9x256xf32, #tpu.memory_space<vmem>>, vector<9x256xf32>
      %14 = arith.addf %13, %3 : vector<9x256xf32>
      %c0_11 = arith.constant 0 : index
      %c0_12 = arith.constant 0 : index
      %15 = vector.load %arg7[%c0_11, %c0_12] : memref<9x256xf32, #tpu.memory_space<vmem>>, vector<9x256xf32>
      tpu.vector_store %arg7[%c0_11, %c0_12], %14 {strides = array<i32>} : memref<9x256xf32, #tpu.memory_space<vmem>>, vector<9x256xf32>,
    } else {
    }
    %c0_i32_7 = arith.constant 0 : i32
    %10 = arith.cmpi eq, %arg1, %c0_i32_7 : i32
    %11 = arith.extui %10 : i1 to i32
    %c0_i32_8 = arith.constant 0 : i32
    %12 = arith.cmpi ne, %11, %c0_i32_8 : i32
    scf.if %12 {
      %c0_9 = arith.constant 0 : index
      %c0_10 = arith.constant 0 : index
      %13 = vector.load %arg7[%c0_9, %c0_10] : memref<9x256xf32, #tpu.memory_space<vmem>>, vector<9x256xf32>
      %14 = vector.extract_strided_slice %13 {offsets = [0, 0], sizes = [1, 256], strides = [1, 1]} : vector<9x256xf32> to vector<1x256xf32>
      %c17_i32 = arith.constant 17 : i32
      %15 = tpu.dynamic_rotate %14 by %c17_i32 dim 1 : vector<1x256xf32>, i32 -> vector<1x256xf32>
      %c0_11 = arith.constant 0 : index
      %c0_12 = arith.constant 0 : index
      %16 = vector.load %arg4[%c0_11, %c0_12] : memref<9x256xf32, #tpu.memory_space<vmem>>, vector<1x256xf32>
      %17 = arith.mulf %15, %16 : vector<1x256xf32>
      %18 = vector.extract_strided_slice %13 {offsets = [1, 0], sizes = [1, 256], strides = [1, 1]} : vector<9x256xf32> to vector<1x256xf32>
      %c16_i32 = arith.constant 16 : i32
      %19 = tpu.dynamic_rotate %18 by %c16_i32 dim 1 : vector<1x256xf32>, i32 -> vector<1x256xf32>
      %c1 = arith.constant 1 : index
      %c0_13 = arith.constant 0 : index
      %20 = vector.load %arg4[%c1, %c0_13] : memref<9x256xf32, #tpu.memory_space<vmem>>, vector<1x256xf32>
      %21 = arith.mulf %19, %20 : vector<1x256xf32>
      %22 = arith.addf %17, %21 : vector<1x256xf32>
      %23 = vector.extract_strided_slice %13 {offsets = [2, 0], sizes = [1, 256], strides = [1, 1]} : vector<9x256xf32> to vector<1x256xf32>
      %c15_i32 = arith.constant 15 : i32
      %24 = tpu.dynamic_rotate %23 by %c15_i32 dim 1 : vector<1x256xf32>, i32 -> vector<1x256xf32>
      %c2 = arith.constant 2 : index
      %c0_14 = arith.constant 0 : index
      %25 = vector.load %arg4[%c2, %c0_14] : memref<9x256xf32, #tpu.memory_space<vmem>>, vector<1x256xf32>
      %26 = arith.mulf %24, %25 : vector<1x256xf32>
      %27 = arith.addf %22, %26 : vector<1x256xf32>
      %28 = vector.extract_strided_slice %13 {offsets = [3, 0], sizes = [1, 256], strides = [1, 1]} : vector<9x256xf32> to vector<1x256xf32>
      %c1_i32 = arith.constant 1 : i32
      %29 = tpu.dynamic_rotate %28 by %c1_i32 dim 1 : vector<1x256xf32>, i32 -> vector<1x256xf32>
      %c3 = arith.constant 3 : index
      %c0_15 = arith.constant 0 : index
      %30 = vector.load %arg4[%c3, %c0_15] : memref<9x256xf32, #tpu.memory_space<vmem>>, vector<1x256xf32>
      %31 = arith.mulf %29, %30 : vector<1x256xf32>
      %32 = arith.addf %27, %31 : vector<1x256xf32>
      %33 = vector.extract_strided_slice %13 {offsets = [4, 0], sizes = [1, 256], strides = [1, 1]} : vector<9x256xf32> to vector<1x256xf32>
      %34 = arith.addf %32, %33 : vector<1x256xf32>
      %35 = vector.extract_strided_slice %13 {offsets = [5, 0], sizes = [1, 256], strides = [1, 1]} : vector<9x256xf32> to vector<1x256xf32>
      %c255_i32 = arith.constant 255 : i32
      %36 = tpu.dynamic_rotate %35 by %c255_i32 dim 1 : vector<1x256xf32>, i32 -> vector<1x256xf32>
      %c5 = arith.constant 5 : index
      %c0_16 = arith.constant 0 : index
      %37 = vector.load %arg4[%c5, %c0_16] : memref<9x256xf32, #tpu.memory_space<vmem>>, vector<1x256xf32>
      %38 = arith.mulf %36, %37 : vector<1x256xf32>
      %39 = arith.addf %34, %38 : vector<1x256xf32>
      %40 = vector.extract_strided_slice %13 {offsets = [6, 0], sizes = [1, 256], strides = [1, 1]} : vector<9x256xf32> to vector<1x256xf32>
      %c241_i32 = arith.constant 241 : i32
      %41 = tpu.dynamic_rotate %40 by %c241_i32 dim 1 : vector<1x256xf32>, i32 -> vector<1x256xf32>
      %c6 = arith.constant 6 : index
      %c0_17 = arith.constant 0 : index
      %42 = vector.load %arg4[%c6, %c0_17] : memref<9x256xf32, #tpu.memory_space<vmem>>, vector<1x256xf32>
      %43 = arith.mulf %41, %42 : vector<1x256xf32>
      %44 = arith.addf %39, %43 : vector<1x256xf32>
      %45 = vector.extract_strided_slice %13 {offsets = [7, 0], sizes = [1, 256], strides = [1, 1]} : vector<9x256xf32> to vector<1x256xf32>
      %c240_i32 = arith.constant 240 : i32
      %46 = tpu.dynamic_rotate %45 by %c240_i32 dim 1 : vector<1x256xf32>, i32 -> vector<1x256xf32>
      %c7 = arith.constant 7 : index
      %c0_18 = arith.constant 0 : index
      %47 = vector.load %arg4[%c7, %c0_18] : memref<9x256xf32, #tpu.memory_space<vmem>>, vector<1x256xf32>
      %48 = arith.mulf %46, %47 : vector<1x256xf32>
      %49 = arith.addf %44, %48 : vector<1x256xf32>
      %50 = vector.extract_strided_slice %13 {offsets = [8, 0], sizes = [1, 256], strides = [1, 1]} : vector<9x256xf32> to vector<1x256xf32>
      %c239_i32 = arith.constant 239 : i32
      %51 = tpu.dynamic_rotate %50 by %c239_i32 dim 1 : vector<1x256xf32>, i32 -> vector<1x256xf32>
      %c8 = arith.constant 8 : index
      %c0_19 = arith.constant 0 : index
      %52 = vector.load %arg4[%c8, %c0_19] : memref<9x256xf32, #tpu.memory_space<vmem>>, vector<1x256xf32>
      %53 = arith.mulf %51, %52 : vector<1x256xf32>
      %54 = arith.addf %49, %53 : vector<1x256xf32>
      %c0_20 = arith.constant 0 : index
      %55 = memref.load %arg3[%c0_20] : memref<1xf32, #tpu.memory_space<smem>>
      %56 = vector.broadcast %55 : f32 to vector<1x256xf32>
      %57 = arith.addf %54, %56 : vector<1x256xf32>
      %58 = arith.negf %57 : vector<1x256xf32>
      %59 = math.exp %58 : vector<1x256xf32>
      %cst_21 = arith.constant 1.000000e+00 : f32
      %60 = vector.broadcast %cst_21 : f32 to vector<1x256xf32>
      %61 = arith.addf %60, %59 : vector<1x256xf32>
      %62 = arith.divf %60, %61 : vector<1x256xf32>
      %c0_22 = arith.constant 0 : index
      %c0_23 = arith.constant 0 : index
      %c0_24 = arith.constant 0 : index
      %63 = vector.load %arg6[%c0_22, %c0_23, %c0_24] : memref<1x1x256xf32, #tpu.memory_space<vmem>>, vector<1x1x256xf32>
      %64 = vector.shape_cast %63 : vector<1x1x256xf32> to vector<1x256xf32>
      %65 = vector.shape_cast %62 : vector<1x256xf32> to vector<1x1x256xf32>
      tpu.vector_store %arg6[%c0_22, %c0_23, %c0_24], %65 {strides = array<i32>} : memref<1x1x256xf32, #tpu.memory_space<vmem>>, vector<1x1x256xf32>,
    } else {
    }
    return
  }
  func.func @transform_0(%arg0: i32, %arg1: i32) -> (i32, i32) {
    %c0_i32 = arith.constant 0 : i32
    %c0_i32_0 = arith.constant 0 : i32
    return %arg1, %c0_i32 : i32, i32
  }
  func.func @transform_1(%arg0: i32, %arg1: i32) -> i32 {
    %c0_i32 = arith.constant 0 : i32
    %c0_i32_0 = arith.constant 0 : i32
    return %c0_i32 : i32
  }
  func.func @transform_2(%arg0: i32, %arg1: i32) -> (i32, i32) {
    %c0_i32 = arith.constant 0 : i32
    %c0_i32_0 = arith.constant 0 : i32
    %c0_i32_1 = arith.constant 0 : i32
    return %c0_i32, %c0_i32_0 : i32, i32
  }
  func.func @transform_3(%arg0: i32, %arg1: i32) -> (i32, i32, i32) {
    %c0_i32 = arith.constant 0 : i32
    %c0_i32_0 = arith.constant 0 : i32
    return %arg0, %arg1, %c0_i32 : i32, i32, i32
  }
  func.func @transform_4(%arg0: i32, %arg1: i32) -> (i32, i32, i32) {
    %c0_i32 = arith.constant 0 : i32
    %c0_i32_0 = arith.constant 0 : i32
    %c0_i32_1 = arith.constant 0 : i32
    return %arg0, %c0_i32, %c0_i32_0 : i32, i32, i32
  }
}

</mosaic_0001>

<bundles_post_ra>
// kernel: tpu_custom_call.1
= control target key start
LH: loop header
LB: loop body
LE: loop exit
PB: predicated region body
PF: predicated region fallthrough
CT: control target
= control target key end

     0   :  { %s1289_s0 = inlined_call_operand.hbm [shape: f32[4,9], index: 0, kind: input, shape index: {}]   ;;  %s1290_s1 = inlined_call_operand.<no memory space> [shape: f32[1], index: 1, kind: input, shape index: {}]   ;;  %s1291_s2 = inlined_call_operand.hbm [shape: f32[9,256], index: 2, kind: input, shape index: {}]   ;;  %s1292_s3 = inlined_call_operand.hbm [shape: f32[2,4,256], index: 3, kind: input, shape index: {}]   ;;  %s1293_s4 = inlined_call_operand.hbm [shape: f32[2,1,256], index: 4, kind: output, shape index: {}]  }
   0x1   :  { %9 = sst [smem:[#allocation3]] %s1290_s1 }
   0x2   :  { %10 = vsyncpa [#allocation5], 0 }
   0x3   :  { %11 = vsyncpa [#allocation8], 0 }
   0x4   :  { %12 = vsyncpa [#allocation6], 0 }
   0x5   :  { %14 = vsyncpa [#allocation6 + $0x1], 0  ;;  %s1095_s17 = smov 0   ;;  %s1097_s18 = smov 0  }
   0x6   :  { %s1099_s19 = smov 0   ;;  %s1101_s20 = smov 0  }
   0x7   :  { %s1103_s21 = smov 0   ;;  %s1105_s22 = smov 0  }
   0x8 LB: > { %s1126_s1 = sadd.s32 4294967295, %s1053_s22   ;;  %s743_s23 = sadd.s32 4294967294, %s1053_s22   ;;  %s1053_s22 = sphi %s1105_s22, %s20_s22   ;;  %s1049_s21 = sphi %s1103_s21, %s1305_s21   ;;  %s1045_s20 = sphi %s1101_s20, %s1304_s20   ;;  %s1041_s19 = sphi %s1099_s19, %s1303_s19   ;;  %s1037_s18 = sphi %s1097_s18, %s1302_s18   ;;  %s1033_s17 = sphi %s1095_s17, %s1301_s17  }
   0x9   : > { %p122_p0 = scmp.ne.s32.totalorder %s1037_s18, %s1033_s17  ;;  %p123_p1 = scmp.eq.s32.totalorder %s1126_s1, 0 }
   0xa   : > { %p146_p2 = scmp.eq.s32.totalorder %s1126_s1, 1  ;;  %p152_p3 = scmp.eq.s32.totalorder %s743_s23, 1 }
   0xb   : > { %p1135_p4 = por %p123_p1, %p122_p0  ;;  %p744_p5 = scmp.ge.s32.totalorder %s1053_s22, 1 }
   0xc   : > { %p1140_p6 = por %p152_p3, %p122_p0  ;;  %p159_p7 = scmp.lt.s32.totalorder %s1053_s22, 3 }
   0xd   : > { %s173_s28 = sshll.u32 %s1289_s0, 4  ;;  %p747_p9 = scmp.ge.s32.totalorder %s1053_s22, 2  ;;  %s174_s28 = int_to_ptr.hbm [resolvable:$true] %s173_s28 }
   0xe   : > { %p1148_p8 = pnand %p744_p5, %p159_p7  ;;  %s1055_s30 = smov [#allocation4]  }
   0xf   : > { %s175_s5 = sshll.u32 %s1055_s30, 4  ;;  %s187_s8 = sshll.u32 %s1291_s2, 4  ;;  %s176_s5 = int_to_ptr.vmem [resolvable:$true] %s175_s5  ;;  %s188_s8 = int_to_ptr.hbm [resolvable:$true] %s187_s8 }
  0x10   : > { %p783_p10 = pneg %p1148_p8  ;;  %s1056_s9 = smov [#allocation7]  }
  0x11   : > { %s189_s10 = sshll.u32 %s1056_s9, 4  ;;  %s1057_s11 = smov 256   ;;  %s190_s10 = int_to_ptr.vmem [resolvable:$true] %s189_s10 }
  0x12   : > { %p784_p11 = pnand %p783_p10, %p123_p1  ;;  %s1058_s12 = smov 16  }
  0x13   : > { %s32_s13 = sadd.s32 1, %s1049_s21  ;;  %s109_s14 = sadd.s32 1, %s1041_s19 }
  0x14   : > { %786 = dma.hbm_to_vmem [thread:$0]  (!%p784_p11), %s174_s28, 64, %s176_s5, [#allocation5]  }
  0x15   : > { %789 = dma.hbm_to_vmem [thread:$0]  (!%p784_p11), %s188_s8, 512, %s190_s10, [#allocation8], %s1057_s11, %s1057_s11, %s1058_s12  }
  0x16   : > { %p34_p12 = scmp.ge.s32.totalorder %s32_s13, 2  ;;  %p116_p13 = scmp.ne.s32.totalorder %s1041_s19, %s1037_s18 }
  0x17   : > { %p117_p0 = scmp.eq.s32.totalorder %s1053_s22, 0  ;;  %p800_p3 = scmp.lt.s32.totalorder %s1053_s22, 2 }
  0x18   : > { %s1307_s13 = smov (%p34_p12, %s32_s13), 0  ;;  %p1174_p7 = por %p146_p2, %p116_p13 }
  0x19   : > { %p1168_p5 = por %p117_p0, %p116_p13  ;;  %s104_s23 = ssub.s32 %s1049_s21, %s1307_s13 }
  0x1a   : > { %s203_s26 = sand.u32 1, %s1053_s22   ;;  %p107_p10 = scmp.eq.s32.totalorder %s104_s23, 0 }
  0x1b   : > { %s205_s27 = sand.u32 1, %s1041_s19   ;;  %s768_s28 = sshll.u32 %s1049_s21, 3 }
  0x1c   : > { %s1184_s30 = scalar_select %p107_p10, %s1041_s19, %s109_s14  }
  0x1d   : > { %s748_s5 = sshll.u32 %s205_s27, 3  ;;  %s214_s8 = scalar_lea.hbm %s1292_s3, %s768_s28 }
  0x1e   : > { %s216_s9 = sshll.u32 %s214_s8, 4  ;;  %s207_s10 = scalar_lea.vmem [#allocation9], %s748_s5  ;;  %s217_s9 = int_to_ptr.hbm [resolvable:$true] %s216_s9 }
  0x1f   : > { %s218_s11 = sshll.u32 %s207_s10, 4  ;;  %p791_p2 = pnand %p800_p3, %p1168_p5  ;;  %s219_s11 = int_to_ptr.vmem [resolvable:$true] %s218_s11 }
  0x20   : > { %s204_s12 = scalar_lea.sflag [#allocation5], %s203_s26  ;;  %227 = sbr.rel (%p1148_p8) target bundleno = 549 (0x225), region = 36 }
  0x21   : > { %793 = dma.hbm_to_vmem [thread:$0]  (!%p791_p2), %s217_s9, 128, %s219_s11, %s204_s12  }
  0x25   : > { %1016 = dma.done.wait (%p123_p1), [#allocation5], 64  }
  0x26   : > { %1018 = vsyncadd (%p123_p1), [#allocation5], 4294967232 }
  0x27   : > { %1020 = dma.done.wait (%p123_p1), [#allocation8], 512  }
  0x28   : > { %1022 = vsyncadd (%p123_p1), [#allocation8], 4294966784  ;;  %s239_s14 = sand.u32 1, %s1126_s1   ;;  %s1205_s15 = sand.u32 1, %s1037_s18  }
  0x29   : > { %s754_s29 = sshll.u32 %s1205_s15, 3  ;;  %s240_s23 = scalar_lea.sflag [#allocation5], %s239_s14 }
  0x2a   : > { %s243_s26 = scalar_lea.vmem [#allocation9], %s754_s29 }
  0x2b   : > { %1024 = dma.done.wait (%p1135_p4), %s240_s23, 128  }
  0x2c   : > { %1026 = vsyncadd (%p1135_p4), %s240_s23, 4294967168  ;;  %v270_v0 = vld [vmem:[#allocation4] sm:$0xf]  ;;  %v269_v1 = vld [vmem:[%s243_s26] sm:$0xff]  ;;  %vm314_vm0 = vcmask 1043456   ;;  %vm307_vm1 = vcmask 31744   ;;  %v400_v31 = vlaneseq }
  0x2d   : > { %271 = vxpose.xlu0.b32.start.end [1/1] (short) (narrow) %v270_v0, 16  ;;  %304 = vst [vmem:[#allocation1] ss:$2 sm:$0xff] %v269_v1  ;;  %s1059_s1 = smov 17   ;;  %s1060_s24 = smov 16  }
  0x2e   : > { %s1061_s27 = smov 15   ;;  %s1062_s28 = smov 1   ;;  %v1231_v33 = vand.u32 127, %v400_v31  ;;  %v427_v35 = vld [vmem:[#allocation7 + $0x1] ss:$8 sm:$0x3] }
  0x2f   : > { %s1063_s5 = smov 127   ;;  %s1064_s6 = smov 113   ;;  %v405_v36 = vld [vmem:[#allocation7] ss:$8 sm:$0x3]  ;;  %v429_v39 = vperm.slane %v427_v35, 0 }
  0x30   : > { %s1065_s7 = smov 112   ;;  %s1066_s8 = smov 111   ;;  %vm423_vm2 = vcmp.lt.s32.totalorder %v1231_v33, 16  ;;  %v449_v37 = vld [vmem:[#allocation7 + $0x2] ss:$8 sm:$0x3] }
  0x31   : > { %vm402_vm3 = vcmp.lt.s32.totalorder %v1231_v33, 17  ;;  %v430_v40 = vperm.slane %v427_v35, 1  ;;  %vm445_vm4 = vcmp.lt.s32.totalorder %v1231_v33, 15  ;;  %v407_v41 = vperm.slane %v405_v36, 0  ;;  %s571_s9 = sld [smem:[#allocation3]]  ;;  %s755_s10 = sshll.u32 %s1205_s15, 1 }
  0x32   : > { %v471_v44 = vld [vmem:[#allocation7 + $0x3] ss:$8 sm:$0x3]  ;;  %v408_v45 = vperm.slane %v405_v36, 1  ;;  %v451_v47 = vperm.slane %v449_v37, 0  ;;  %v452_v48 = vperm.slane %v449_v37, 1 }
  0x33   : > { %vm467_vm5 = vcmp.lt.s32.totalorder %v1231_v33, 1  ;;  %v473_v55 = vperm.slane %v471_v44, 0  ;;  %v474_v56 = vperm.slane %v471_v44, 1  ;;  %v499_v0 = vld [vmem:[#allocation7 + $0x5] ss:$8 sm:$0x3] }
  0x34   : > { %v305_v2 = vld.sshfl [vmem:[#allocation1] sm:$0xff pattern:$0x75316420]  ;;  %v306_v3 = vld.sshfl [vmem:[#allocation1 + $0x8] sm:$0xff pattern:$0x75316420] }
  0x35   : > { %756 = vmatpush.msk.msra.mxu0 %vm314_vm0, %v305_v2  ;;  %769 = vmatpush.msk.msra.mxu2 %vm314_vm0, %v305_v2  ;;  %vm495_vm6 = vcmp.lt.s32.totalorder %v1231_v33, 127  ;;  %vm517_vm7 = vcmp.lt.s32.totalorder %v1231_v33, 113  ;;  %vm539_vm8 = vcmp.lt.s32.totalorder %v1231_v33, 112  ;;  %vm557_vm9 = vcmp.lt.s32.totalorder %v1231_v33, 111  ;;  %s765_s11 = sshll.u32 %s1045_s20, 1  ;;  %s268_s20 = scalar_lea.vmem [#allocation10], %s755_s10 }
  0x36   : > { %759 = vmatpush.msk.msra.mxu1 %vm314_vm0, %v306_v3  ;;  %770 = vmatpush.msk.msra.mxu3 %vm314_vm0, %v306_v3  ;;  %s635_s29 = scalar_lea.hbm %s1293_s4, %s765_s11  ;;  %s637_s23 = sshll.u32 %s268_s20, 4  ;;  %s638_s23 = int_to_ptr.vmem [resolvable:$true] %s637_s23 }
  0x37   : > { %s639_s26 = sshll.u32 %s635_s29, 4  ;;  %s640_s26 = int_to_ptr.hbm [resolvable:$true] %s639_s26 }
  0xd1   : > { %v287_v4 = vpop.trf.xlu0 }
  0xd2   : > { %757 = vmatmul.msk.f32.vlgmr.msra.gmra.mxu0 %vm307_vm1, %v287_v4  ;;  %760 = vmatmul.msk.f32.vlgmr.msra.gmra.mxu1 %vm307_vm1, %v287_v4 }
  0xd9   : > { %v288_v5 = vpop.trf.xlu0 }
  0xda   : > { %758 = vmatmul.msk.f32.vlgmr.msra.gmra.mxu2 %vm307_vm1, %v288_v5  ;;  %761 = vmatmul.msk.f32.vlgmr.msra.gmra.mxu3 %vm307_vm1, %v288_v5  ;;  %v521_v5 = vld [vmem:[#allocation7 + $0x6] ss:$8 sm:$0x3]  ;;  %vm616_vm1 = vcmask 1040384  }
 0x14f   : > { %v1212_v6 = vpop.f32.mrf.mxu0  ;;  %v1214_v7 = vpop.f32.mrf.mxu1 }
 0x150   : > { %398 = vrot.lane.b32.xlu1 %v1214_v7, %s1059_s1  ;;  %396 = vrot.lane.b32.xlu0 %v1212_v6, %s1059_s1  ;;  %v416_v8 = vrot.slane %v1214_v7, 1  ;;  %v415_v9 = vrot.slane %v1212_v6, 1  ;;  %v437_v10 = vrot.slane %v1212_v6, 2  ;;  %v438_v13 = vrot.slane %v1214_v7, 2  ;;  %s625_s1 = scalar_lea.sflag [#allocation6], %s1205_s15 }
 0x151   : > { %v459_v14 = vrot.slane %v1212_v6, 3  ;;  %v460_v15 = vrot.slane %v1214_v7, 3  ;;  %v487_v16 = vrot.slane %v1212_v6, 5  ;;  %v488_v17 = vrot.slane %v1214_v7, 5 }
 0x152   : > { %421 = vrot.lane.b32.xlu2 %v416_v8, %s1060_s24  ;;  %v509_v18 = vrot.slane %v1212_v6, 6  ;;  %v510_v19 = vrot.slane %v1214_v7, 6  ;;  %v531_v20 = vrot.slane %v1212_v6, 7  ;;  %v532_v21 = vrot.slane %v1214_v7, 7 }
 0x153   : > { %v501_v8 = vperm.slane %v499_v0, 0 }
 0x158   : > { %419 = vrot.lane.b32.xlu1 %v415_v9, %s1060_s24  ;;  %s977_s24 = sshra.s32 %s640_s26, 4  ;;  %s978_s24 = int_to_ptr.hbm [resolvable:$true] %s977_s24 }
 0x159   : > { %p984_p11 = scmp.lt.s32.totalorder %s978_s24, %s1293_s4 }
 0x15a   : > { %441 = vrot.lane.b32.xlu2 %v437_v10, %s1061_s27 }
 0x15d   : > { %v339_v11 = vpop.f32.mrf.mxu2  ;;  %v362_v12 = vpop.f32.mrf.mxu3 }
 0x15e   : > { %371 = vst [vmem:[#allocation2 + $0x18] sm:$0x1] %v339_v11  ;;  %v502_v11 = vperm.slane %v499_v0, 1 }
 0x15f   : > { %372 = vst [vmem:[#allocation2 + $0x8] sm:$0x1] %v362_v12 }
 0x160   : > { %443 = vrot.lane.b32.xlu1 %v438_v13, %s1061_s27  ;;  %s979_s27 = scalar_lea.hbm %s978_s24, 2 }
 0x161   : > { %p980_p1 = scmp.ne.s32.totalorder %s978_s24, %s979_s27 }
 0x162   : > { %463 = vrot.lane.b32.xlu2 %v459_v14, %s1062_s28  ;;  %v523_v14 = vperm.slane %v521_v5, 0 }
 0x163   : > { %p981_p4 = pnand %p980_p1, %p1174_p7 }
 0x165   : > { %v394_v22 = vld [vmem:[#allocation2 + $0x18] sm:$0x1]  ;;  %p982_p8 = pneg %p981_p4 }
 0x166   : > { %v395_v23 = vld [vmem:[#allocation2 + $0x8] sm:$0x1] }
 0x168   : > { %465 = vrot.lane.b32.xlu1 %v460_v15, %s1062_s28  ;;  %v543_v15 = vld [vmem:[#allocation7 + $0x7] ss:$8 sm:$0x3] }
 0x16a   : > { %491 = vrot.lane.b32.xlu2 %v487_v16, %s1063_s5 }
 0x170   : > { %493 = vrot.lane.b32.xlu1 %v488_v17, %s1063_s5 }
 0x172   : > { %513 = vrot.lane.b32.xlu2 %v509_v18, %s1064_s6 }
 0x178   : > { %515 = vrot.lane.b32.xlu1 %v510_v19, %s1064_s6  ;;  %v524_v19 = vperm.slane %v521_v5, 1  ;;  %s983_s6 = scalar_lea.hbm %s1293_s4, 4 }
 0x179   : > { %p985_p12 = scmp.lt.s32.totalorder %s983_s6, %s979_s27 }
 0x17a   : > { %535 = vrot.lane.b32.xlu2 %v531_v20, %s1065_s7 }
 0x17b   : > { %p986_p13 = por %p985_p12, %p984_p11 }
 0x17d   : > { %p987_p0 = pnand %p986_p13, %p982_p8 }
 0x180   : > { %537 = vrot.lane.b32.xlu1 %v532_v21, %s1065_s7  ;;  %v481_v21 = vrot.slane %v1212_v6, 4 }
 0x182   : > { %553 = vrot.lane.b32.xlu2 %v394_v22, %s1066_s8  ;;  %v482_v22 = vrot.slane %v1214_v7, 4 }
 0x188   : > { %555 = vrot.lane.b32.xlu1 %v395_v23, %s1066_s8 }
 0x1ac   : > { %v422_v24 = vpop.permute.xlu2 %421 }
 0x1b4   : > { %v442_v26 = vpop.permute.xlu2 %441 }
 0x1bc   : > { %v464_v29 = vpop.permute.xlu2 %463 }
 0x1c2   : > { %v399_v25 = vpop.permute.xlu1 %398  ;;  %v397_v38 = vpop.permute.xlu0 %396 }
 0x1c3   : > { %v403_v49 = vsel %vm402_vm3, %v397_v38, %v399_v25  ;;  %v404_v50 = vsel %vm402_vm3, %v399_v25, %v397_v38  ;;  %vm621_vm3 = vcmp.lt.s32.totalorder %v400_v31, 256 }
 0x1c4   : > { %v492_v32 = vpop.permute.xlu2 %491  ;;  %v411_v60 = vmul.f32 %v407_v41, %v404_v50  ;;  %v412_v61 = vmul.f32 %v408_v45, %v403_v49 }
 0x1ca   : > { %v420_v27 = vpop.permute.xlu1 %419 }
 0x1cb   : > { %v424_v42 = vsel %vm423_vm2, %v420_v27, %v422_v24  ;;  %v425_v43 = vsel %vm423_vm2, %v422_v24, %v420_v27  ;;  %v545_v27 = vperm.slane %v543_v15, 0 }
 0x1cc   : > { %v514_v46 = vpop.permute.xlu2 %513  ;;  %v433_v53 = vmul.f32 %v429_v39, %v425_v43  ;;  %v434_v54 = vmul.f32 %v430_v40, %v424_v42 }
 0x1ce   : > { %v435_v1 = vadd.f32 %v433_v53, %v411_v60  ;;  %v436_v2 = vadd.f32 %v434_v54, %v412_v61 }
 0x1d2   : > { %v444_v28 = vpop.permute.xlu1 %443 }
 0x1d3   : > { %v446_v51 = vsel %vm445_vm4, %v442_v26, %v444_v28  ;;  %v447_v52 = vsel %vm445_vm4, %v444_v28, %v442_v26  ;;  %v546_v28 = vperm.slane %v543_v15, 1 }
 0x1d4   : > { %v455_v62 = vmul.f32 %v451_v47, %v447_v52  ;;  %v456_v63 = vmul.f32 %v452_v48, %v446_v51  ;;  %v536_v16 = vpop.permute.xlu2 %535  ;;  %v572_v52 = vstv %s571_s9 }
 0x1d6   : > { %v457_v9 = vadd.f32 %v455_v62, %v435_v1  ;;  %v458_v10 = vadd.f32 %v456_v63, %v436_v2 }
 0x1da   : > { %v466_v30 = vpop.permute.xlu1 %465 }
 0x1db   : > { %v468_v58 = vsel %vm467_vm5, %v464_v29, %v466_v30  ;;  %v469_v59 = vsel %vm467_vm5, %v466_v30, %v464_v29  ;;  %v561_v29 = vld [vmem:[#allocation7 + $0x10] ss:$8 sm:$0x3] }
 0x1dc   : > { %v477_v3 = vmul.f32 %v473_v55, %v469_v59  ;;  %v478_v4 = vmul.f32 %v474_v56, %v468_v58  ;;  %v563_v38 = vperm.slane %v561_v29, 0  ;;  %v564_v6 = vperm.slane %v561_v29, 1  ;;  %v554_v42 = vpop.permute.xlu2 %553 }
 0x1de   : > { %v479_v17 = vadd.f32 %v477_v3, %v457_v9  ;;  %v480_v18 = vadd.f32 %v478_v4, %v458_v10 }
 0x1e0   : > { %v486_v35 = vadd.f32 %v482_v22, %v480_v18 }
 0x1e2   : > { %v494_v34 = vpop.permute.xlu1 %493 }
 0x1e3   : > { %v496_v12 = vsel %vm495_vm6, %v492_v32, %v494_v34  ;;  %v497_v13 = vsel %vm495_vm6, %v494_v34, %v492_v32  ;;  %v485_v34 = vadd.f32 %v481_v21, %v479_v17 }
 0x1e4   : > { %v505_v25 = vmul.f32 %v501_v8, %v496_v12  ;;  %v506_v26 = vmul.f32 %v502_v11, %v497_v13 }
 0x1e6   : > { %v507_v39 = vadd.f32 %v505_v25, %v485_v34  ;;  %v508_v7 = vadd.f32 %v506_v26, %v486_v35 }
 0x1ea   : > { %v516_v57 = vpop.permute.xlu1 %515 }
 0x1eb   : > { %v518_v23 = vsel %vm517_vm7, %v514_v46, %v516_v57  ;;  %v519_v24 = vsel %vm517_vm7, %v516_v57, %v514_v46 }
 0x1ec   : > { %v527_v36 = vmul.f32 %v523_v14, %v518_v23  ;;  %v528_v37 = vmul.f32 %v524_v19, %v519_v24 }
 0x1ee   : > { %v529_v43 = vadd.f32 %v527_v36, %v507_v39  ;;  %v530_v44 = vadd.f32 %v528_v37, %v508_v7 }
 0x1f2   : > { %v538_v20 = vpop.permute.xlu1 %537 }
 0x1f3   : > { %v540_v30 = vsel %vm539_vm8, %v536_v16, %v538_v20  ;;  %v541_v32 = vsel %vm539_vm8, %v538_v20, %v536_v16 }
 0x1f4   : > { %v549_v40 = vmul.f32 %v545_v27, %v540_v30  ;;  %v550_v41 = vmul.f32 %v546_v28, %v541_v32 }
 0x1f6   : > { %v551_v48 = vadd.f32 %v549_v40, %v529_v43  ;;  %v552_v49 = vadd.f32 %v550_v41, %v530_v44 }
 0x1fa   : > { %v556_v45 = vpop.permute.xlu1 %555 }
 0x1fb   : > { %v558_v46 = vsel %vm557_vm9, %v554_v42, %v556_v45  ;;  %v559_v47 = vsel %vm557_vm9, %v556_v45, %v554_v42 }
 0x1fc   : > { %v567_v50 = vmul.f32 %v563_v38, %v558_v46  ;;  %v568_v51 = vmul.f32 %v564_v6, %v559_v47 }
 0x1fe   : > { %v569_v53 = vadd.f32 %v567_v50, %v551_v48  ;;  %v570_v54 = vadd.f32 %v568_v51, %v552_v49 }
 0x200   : > { %v573_v33 = vadd.f32 %v572_v52, %v569_v53  ;;  %v574_v55 = vadd.f32 %v572_v52, %v570_v54 }
 0x202   : > { %v762_v56 = vmul.f32 -1.442695, %v573_v33  ;;  %v763_v57 = vmul.f32 -1.442695, %v574_v55 }
 0x204   : > { %865 = vpow2.f32 %v762_v56 }
 0x205   : > { %867 = vpow2.f32 %v763_v57 }
 0x20a   : > { %v866_v58 = vpop.eup %865 }
 0x20b   : > { %v868_v59 = vpop.eup %867  ;;  %v581_v60 = vadd.f32 1.0, %v866_v58 }
 0x20c   : > { %v582_v61 = vadd.f32 1.0, %v868_v59 }
 0x20d   : > { %869 = vrcp.f32 %v581_v60  ;;  %vm588_vm12 = vweird.f32 %v581_v60  ;;  %v594_v11 = vand.u32 2147483648, %v581_v60  ;;  %v592_v13 = vand.u32 2147483647, %v581_v60 }
 0x20e   : > { %871 = vrcp.f32 %v582_v61  ;;  %v609_v5 = vand.u32 2147483648, %v582_v61  ;;  %v607_v9 = vand.u32 2147483647, %v582_v61  ;;  %vm603_vm14 = vweird.f32 %v582_v61 }
 0x20f   : > { %v595_v18 = vor.u32 1.1754944e-38, %v594_v11  ;;  %vm593_vm2 = vcmp.eq.f32.partialorder %v592_v13, 8.507059e+37 }
 0x210   : > { %v610_v15 = vor.u32 1.1754944e-38, %v609_v5  ;;  %vm608_vm0 = vcmp.eq.f32.partialorder %v607_v9, 8.507059e+37 }
 0x213   : > { %v870_v62 = vpop.eup %869 }
 0x214   : > { %v872_v63 = vpop.eup %871  ;;  %v584_v0 = vmul.f32 %v870_v62, %v581_v60  ;;  %vm589_vm10 = vweird.f32 %v870_v62 }
 0x215   : > { %v599_v1 = vmul.f32 %v872_v63, %v582_v61  ;;  %vm604_vm11 = vweird.f32 %v872_v63  ;;  %vm1248_vm13 = vmor %vm588_vm12, %vm589_vm10 }
 0x216   : > { %v585_v2 = vsub.f32 1.0, %v584_v0  ;;  %vm605_vm15 = vmor %vm603_vm14, %vm604_vm11 }
 0x217   : > { %v600_v3 = vsub.f32 1.0, %v599_v1 }
 0x218   : > { %v586_v4 = vmul.f32 %v870_v62, %v585_v2 }
 0x219   : > { %v601_v8 = vmul.f32 %v872_v63, %v600_v3 }
 0x21a   : > { %v587_v10 = vadd.f32 %v870_v62, %v586_v4 }
 0x21b   : > { %v602_v14 = vadd.f32 %v872_v63, %v601_v8 }
 0x21c   : > { %v591_v16 = vsel %vm1248_vm13, %v870_v62, %v587_v10 }
 0x21d   : > { %v606_v17 = vsel %vm605_vm15, %v872_v63, %v602_v14  ;;  %v596_v21 = vsel %vm593_vm2, %v595_v18, %v591_v16 }
 0x21e   : > { %v611_v19 = vsel %vm608_vm0, %v610_v15, %v606_v17 }
 0x21f   : > { %v615_v20 = vrot.slane %v611_v19, 7 }
 0x221   : > { %v617_v22 = vsel %vm616_vm1, %v596_v21, %v615_v20 }
 0x222   : > { %623 = vst.msk [vmem:[%s268_s20] sm:$0x3] %vm621_vm3, %v617_v22 }
 0x223   : > { %990 = shalt.err (!%p987_p0)
}
 0x224   : > { %781 = dma.vmem_to_hbm [thread:$0]  (%p1174_p7), %s638_s23, 32, %s640_s26, %s625_s1  }
 0x225 PF: > { %s651_s15 = sand.u32 1, %s1033_s17   ;;  %p795_p3 = pnand %p747_p9, %p1140_p6 }
 0x226   : > { %s652_s9 = scalar_lea.sflag [#allocation6], %s651_s15 }
 0x227   : > { %p796_p5 = pneg %p795_p3 }
 0x229   : > { %1028 = dma.done.wait (%p796_p5), %s652_s9, 32  }
 0x22a   : > { %1030 = vsyncadd (%p796_p5), %s652_s9, 4294967264  ;;  %s20_s22 = sadd.s32 1, %s1053_s22   ;;  %s1301_s17 = smov %s1037_s18 }
 0x22b   : > { %p17_p10 = scmp.ge.s32.totalorder %s20_s22, 4   ;;  %s1302_s18 = smov %s1041_s19 }
 0x22c   : > { %s1303_s19 = smov %s1184_s30  ;;  %s1304_s20 = smov %s1049_s21 }
 0x22d   : > { %s1305_s21 = smov %s1307_s13  ;;  %19 = sbr.rel (!%p17_p10) target bundleno = 8 (0x8), region = 108 }
 0x232   :  { %658 = vsyncpa [#allocation5], 1 }
 0x233   :  { %660 = vsyncpa [#allocation5 + $0x1], 1 }
 0x234   :  { %661 = vsyncpa [#allocation8], 1 }
 0x235   :  { %662 = vsyncpa [#allocation6], 1 }
 0x236   :  { %664 = vsyncpa [#allocation6 + $0x1], 1 }

</bundles_post_ra>
